<compile_context>
chip_gen: v5e
topology: v5e:2x2
jax: 0.10.0
libtpu: 0.0.40
codegen_flags: <defaults>
</compile_context>

<pallas_src>
import jax
import jax.numpy as jnp
from jax import lax
from jax.experimental import pallas as pl
from jax.experimental.pallas import tpu as pltpu

_SLAB_LANES = 128  # lane-dense packed-output width


def _psmil_kernel(b_ps_ref,                                        # SMEM: (1,) f32 ps_attention bias
                  fs_ref, wcat_ref, fbank_t_ref, w_ps_ref, y_ref,  # VMEM inputs
                  slab_ref, feat_ref, new_fbank_t_ref):            # VMEM outputs
    N, L = fs_ref.shape
    ks = w_ps_ref.shape[1]

    fs = fs_ref[...]                                    # [N, L] f32
    w_cat = wcat_ref[...]                               # [L, 2ks] f32 = [linear | fbank]

    # --- single shared K-sweep for both projections (bf16 MXU operands, f32 accum) ---
    logits_cat = jnp.dot(fs.astype(jnp.bfloat16), w_cat.astype(jnp.bfloat16),
                         preferred_element_type=jnp.float32)        # [N, 2ks]
    ins_logits = logits_cat[:, 0:ks]                    # fs @ linear
    p_logits = logits_cat[:, ks:2 * ks]                 # fs @ fbank   (no_grad path)

    # ins_probs = softmax(fs @ linear, dim=1)            (f32 VPU/EUP math)
    im = jnp.max(ins_logits, axis=1, keepdims=True)
    ie = jnp.exp(ins_logits - im)
    ins_probs = ie / jnp.sum(ie, axis=1, keepdims=True)             # [N, ks]

    # pred = softmax(fs @ fbank, dim=1)
    pm = jnp.max(p_logits, axis=1, keepdims=True)
    pe = jnp.exp(p_logits - pm)
    pred = pe / jnp.sum(pe, axis=1, keepdims=True)                  # [N, ks]

    # alpha = softmax over the N instances of ps_attention(pred)  (Linear(ks, 1))
    a_logit = jnp.sum(pred * w_ps_ref[...], axis=1, keepdims=True) + b_ps_ref[0]  # [N, 1]
    am = jnp.max(a_logit, axis=0, keepdims=True)
    ae = jnp.exp(a_logit - am)
    alpha_col = ae / jnp.sum(ae, axis=0, keepdims=True)             # [N, 1]

    # F = alpha^T @ fs.  N is tiny (8), so a sublane reduction is cheapest; switch to
    # an MXU matmul + N-tiled parallel grid only if bag size grows into the hundreds.
    feat = jnp.sum(alpha_col * fs, axis=0, keepdims=True)           # [1, L]
    feat_ref[...] = feat

    # Y_logit = F @ linear == alpha^T @ (fs @ linear): reuse ins_logits, no 2nd K=512 matmul.
    y_logit = jnp.sum(alpha_col * ins_logits, axis=0, keepdims=True)  # [1, ks]
    ym = jnp.max(y_logit, axis=1, keepdims=True)
    z = y_logit - ym
    y_prob = z - jnp.log(jnp.sum(jnp.exp(z), axis=1, keepdims=True))  # [1, ks]

    # --- fused fbank EMA update (stateful nn.Parameter side effect, made functional) ---
    y_vec = y_ref[...]                                              # [1, ks]
    y_sum = jnp.sum(y_vec, axis=1, keepdims=True)                   # [1, 1]

    lane_idx = lax.broadcasted_iota(jnp.int32, (1, ks), 1).astype(jnp.float32)
    y_max = jnp.max(y_vec, axis=1, keepdims=True)
    y_idx = jnp.min(jnp.where(y_vec == y_max, lane_idx, float(ks)),
                    axis=1, keepdims=True)                          # [1, 1] first argmax(y)
    y_onehot = (lane_idx == y_idx).astype(jnp.float32)              # [1, ks]

    # sel = argmax_n pred[n, y_idx]   (first maximal instance, like torch.argmax)
    pred_y = jnp.sum(pred * y_onehot, axis=1, keepdims=True)        # [N, 1]
    row_idx = lax.broadcasted_iota(jnp.int32, (N, 1), 0).astype(jnp.float32)
    p_best = jnp.max(pred_y, axis=0, keepdims=True)
    sel = jnp.min(jnp.where(pred_y == p_best, row_idx, float(N)),
                  axis=0, keepdims=True)                            # [1, 1]
    sel_onehot = (row_idx == sel).astype(jnp.float32)               # [N, 1]
    critical = jnp.sum(fs * sel_onehot, axis=0, keepdims=True)      # [1, L] = fs[sel]

    fbank_t = fbank_t_ref[...]                                      # [ks, L] (row layout)
    krow_idx = lax.broadcasted_iota(jnp.int32, (ks, 1), 0).astype(jnp.float32)
    y_row_mask = (krow_idx == y_idx)                                # [ks, 1] bool

    fbank_y = jnp.sum(fbank_t * y_row_mask.astype(jnp.float32),
                      axis=0, keepdims=True)                        # [1, L] = fbank[:, y_idx]
    blend = 0.99 * fbank_y + 0.01 * critical                        # [1, L]
    nrm = jnp.sqrt(jnp.sum(blend * blend, axis=1, keepdims=True))   # [1, 1]
    newfy = blend / jnp.maximum(nrm, 1e-12)                         # F.normalize(dim=0)
    nan_cnt = jnp.sum(jnp.where(newfy != newfy, 1.0, 0.0), axis=1, keepdims=True)
    newfy = jnp.where(nan_cnt > 0.0, jnp.mean(fs, axis=0, keepdims=True), newfy)

    do_update = y_sum >= 0.0                                        # [1, 1] (torch: if sum(y) >= 0)
    upd_mask = jnp.logical_and(y_row_mask, do_update)               # [ks, 1]
    new_fbank_t_ref[...] = jnp.where(upd_mask, newfy, fbank_t)      # [ks, L] lane-dense writeback
    # TODO(synk): the PyTorch `print + sys.exit()` guard on a NaN fbank has no kernel equivalent.

    # --- lane-dense packed output slab: [N, 128] ---
    slab_ref[...] = jnp.zeros(slab_ref.shape, slab_ref.dtype)
    slab_ref[:, 0:ks] = ins_probs                                   # cols [0, ks)
    slab_ref[0:1, ks:2 * ks] = y_prob                               # cols [ks, 2ks), row 0
    slab_ref[:, 2 * ks:2 * ks + 1] = alpha_col                      # col  2ks


@jax.jit
def psmil_forward(fs, y, linear, fbank, w_ps, b_ps):
    """Functional PSMIL.forward.  fs: [N, L] flattened features (post-Backbone)."""
    N, L = fs.shape
    ks = linear.shape[1]
    assert 2 * ks + 1 <= _SLAB_LANES
    y2 = y.reshape(1, ks).astype(jnp.float32)

    # One [L, 2ks] weight so the kernel sweeps fs over K once for both projections.
    w_cat = jnp.concatenate([linear, fbank], axis=1)                # [L, 2ks]
    # fbank in row layout so the fused update + its HBM writeback are lane dense.
    fbank_t = fbank.T                                               # [ks, L]

    vmem = pl.BlockSpec(memory_space=pltpu.MemorySpace.VMEM)
    smem = pl.BlockSpec(memory_space=pltpu.MemorySpace.SMEM)

    out_shapes = (
        jax.ShapeDtypeStruct((N, _SLAB_LANES), jnp.float32),        # packed ins_probs | Y_prob | alpha
        jax.ShapeDtypeStruct((1, L), jnp.float32),                  # F
        jax.ShapeDtypeStruct((ks, L), jnp.float32),                 # new_fbank^T
    )

    slab, feat, new_fbank_t = pl.pallas_call(
        _psmil_kernel,
        out_shape=out_shapes,
        in_specs=[smem, vmem, vmem, vmem, vmem, vmem],
        out_specs=(vmem, vmem, vmem),
        input_output_aliases={3: 2},        # fbank_t -> new_fbank_t (in-place style update)
    )(b_ps, fs, w_cat, fbank_t, w_ps, y2)

    ins_probs = slab[:, 0:ks]                                       # [N, ks]
    y_prob = slab[0:1, ks:2 * ks]                                   # [1, ks]
    alpha = slab[:, 2 * ks:2 * ks + 1].reshape(1, N)                # [1, N] == softmax(alpha.T, dim=1)
    y_hat = jnp.argmax(y_prob, axis=1)                              # [1]
    new_fbank = new_fbank_t.T                                       # [L, ks]

    # NOTE: the pred/alpha path mirrors a torch.no_grad() block; wrap in
    # lax.stop_gradient before differentiating this function.
    return y_prob, y_hat, alpha, ins_probs, feat, new_fbank


if __name__ == "__main__":
    key = jax.random.PRNGKey(0)
    # NCHW input; C*H*W == 512 == Backbone.feat_dim (stem = Identity + flatten).
    N, C, H, W = 8, 2, 16, 16
    L = C * H * W
    ks = 2

    k1, k2, k3, k4 = jax.random.split(key, 4)
    x = jax.random.normal(k1, (N, C, H, W), jnp.float32)
    y = jnp.array([[0.0, 1.0]], jnp.float32)                        # one-hot bag label

    # Deterministic parameter init (shapes from PSMIL.__init__; values synthetic).
    bound_lin = (6.0 / L) ** 0.5                                    # ~kaiming_uniform
    linear = jax.random.uniform(k2, (L, ks), jnp.float32, -bound_lin, bound_lin)
    bound_ps = 1.0 / (ks ** 0.5)
    w_ps = jax.random.uniform(k3, (1, ks), jnp.float32, -bound_ps, bound_ps)
    b_ps = jax.random.uniform(k4, (1,), jnp.float32, -bound_ps, bound_ps)

    # Backbone: Identity + flatten (NCHW -> [N, L]).
    fs = x.reshape(N, -1)
    # firsttime: fbank = fs.mean(0, keepdim=True).repeat(ks, 1).T -> [L, ks]
    fbank = jnp.tile(jnp.mean(fs, axis=0, keepdims=True), (ks, 1)).T

    outs = psmil_forward(fs, y, linear, fbank, w_ps, b_ps)
    outs = jax.block_until_ready(outs)
    y_prob, y_hat, alpha, ins_probs, feat, new_fbank = outs

    assert y_prob.shape == (1, ks)
    assert y_hat.shape == (1,)
    assert alpha.shape == (1, N)
    assert ins_probs.shape == (N, ks)
    assert feat.shape == (1, L)
    assert new_fbank.shape == (L, ks)
    assert bool(jnp.isfinite(y_prob).all())
    assert bool(jnp.isfinite(new_fbank).all())
    assert abs(float(jnp.sum(alpha)) - 1.0) < 1e-3

    print("KERNEL_OK")
</pallas_src>

<mosaic_0001>
module attributes {stable_mosaic.version = 11 : i64} {
  func.func @_psmil_kernel(%arg0: memref<1xf32, #tpu.memory_space<smem>>, %arg1: memref<8x512xf32, #tpu.memory_space<vmem>>, %arg2: memref<512x4xf32, #tpu.memory_space<vmem>>, %arg3: memref<2x512xf32, #tpu.memory_space<vmem>>, %arg4: memref<1x2xf32, #tpu.memory_space<vmem>>, %arg5: memref<1x2xf32, #tpu.memory_space<vmem>>, %arg6: memref<8x128xf32, #tpu.memory_space<vmem>>, %arg7: memref<1x512xf32, #tpu.memory_space<vmem>>, %arg8: memref<2x512xf32, #tpu.memory_space<vmem>>) attributes {dimension_semantics = [], scalar_prefetch = 0 : i64, scratch_operands = 0 : i64, tpu.core_type = #tpu.core_type<tc>} {
    %c0 = arith.constant 0 : index
    %c0_0 = arith.constant 0 : index
    %0 = vector.load %arg1[%c0, %c0_0] : memref<8x512xf32, #tpu.memory_space<vmem>>, vector<8x512xf32>
    %c0_1 = arith.constant 0 : index
    %c0_2 = arith.constant 0 : index
    %1 = vector.load %arg2[%c0_1, %c0_2] : memref<512x4xf32, #tpu.memory_space<vmem>>, vector<512x4xf32>
    %2 = arith.truncf %0 : vector<8x512xf32> to vector<8x512xbf16>
    %3 = arith.truncf %1 : vector<512x4xf32> to vector<512x4xbf16>
    %cst = arith.constant dense<0.000000e+00> : vector<8x4xf32>
    %4 = tpu.matmul %2, %3, %cst {dimension_numbers = #tpu.dot_dimension_numbers<[1], [0], [0], [1], [0, 0, 1, 1], [], []>} : vector<8x512xbf16>, vector<512x4xbf16>, vector<8x4xf32> -> vector<8x4xf32>
    %5 = vector.extract_strided_slice %4 {offsets = [0, 0], sizes = [8, 2], strides = [1, 1]} : vector<8x4xf32> to vector<8x2xf32>
    %6 = vector.extract_strided_slice %4 {offsets = [0, 2], sizes = [8, 2], strides = [1, 1]} : vector<8x4xf32> to vector<8x2xf32>
    %cst_3 = arith.constant dense<0xFF800000> : vector<8xf32>
    %7 = vector.multi_reduction <maximumf>, %5, %cst_3 [1] : vector<8x2xf32> to vector<8xf32>
    %8 = vector.shape_cast %7 : vector<8xf32> to vector<8x1xf32>
    %9 = vector.broadcast %8 : vector<8x1xf32> to vector<8x2xf32>
    %10 = arith.subf %5, %9 : vector<8x2xf32>
    %11 = math.exp %10 : vector<8x2xf32>
    %cst_4 = arith.constant dense<0.000000e+00> : vector<8xf32>
    %12 = vector.multi_reduction <add>, %11, %cst_4 [1] : vector<8x2xf32> to vector<8xf32>
    %13 = vector.shape_cast %12 : vector<8xf32> to vector<8x1xf32>
    %14 = vector.broadcast %13 : vector<8x1xf32> to vector<8x2xf32>
    %15 = arith.divf %11, %14 : vector<8x2xf32>
    %cst_5 = arith.constant dense<0xFF800000> : vector<8xf32>
    %16 = vector.multi_reduction <maximumf>, %6, %cst_5 [1] : vector<8x2xf32> to vector<8xf32>
    %17 = vector.shape_cast %16 : vector<8xf32> to vector<8x1xf32>
    %18 = vector.broadcast %17 : vector<8x1xf32> to vector<8x2xf32>
    %19 = arith.subf %6, %18 : vector<8x2xf32>
    %20 = math.exp %19 : vector<8x2xf32>
    %cst_6 = arith.constant dense<0.000000e+00> : vector<8xf32>
    %21 = vector.multi_reduction <add>, %20, %cst_6 [1] : vector<8x2xf32> to vector<8xf32>
    %22 = vector.shape_cast %21 : vector<8xf32> to vector<8x1xf32>
    %23 = vector.broadcast %22 : vector<8x1xf32> to vector<8x2xf32>
    %24 = arith.divf %20, %23 : vector<8x2xf32>
    %c0_7 = arith.constant 0 : index
    %c0_8 = arith.constant 0 : index
    %25 = vector.load %arg4[%c0_7, %c0_8] : memref<1x2xf32, #tpu.memory_space<vmem>>, vector<1x2xf32>
    %26 = vector.broadcast %25 : vector<1x2xf32> to vector<8x2xf32>
    %27 = arith.mulf %24, %26 : vector<8x2xf32>
    %cst_9 = arith.constant dense<0.000000e+00> : vector<8xf32>
    %28 = vector.multi_reduction <add>, %27, %cst_9 [1] : vector<8x2xf32> to vector<8xf32>
    %29 = vector.shape_cast %28 : vector<8xf32> to vector<8x1xf32>
    %c0_10 = arith.constant 0 : index
    %30 = memref.load %arg0[%c0_10] : memref<1xf32, #tpu.memory_space<smem>>
    %31 = vector.broadcast %30 : f32 to vector<8x1xf32>
    %32 = arith.addf %29, %31 : vector<8x1xf32>
    %cst_11 = arith.constant dense<0xFF800000> : vector<1xf32>
    %33 = vector.multi_reduction <maximumf>, %32, %cst_11 [0] : vector<8x1xf32> to vector<1xf32>
    %34 = vector.shape_cast %33 : vector<1xf32> to vector<1x1xf32>
    %35 = vector.broadcast %34 : vector<1x1xf32> to vector<8x1xf32>
    %36 = arith.subf %32, %35 : vector<8x1xf32>
    %37 = math.exp %36 : vector<8x1xf32>
    %cst_12 = arith.constant dense<0.000000e+00> : vector<1xf32>
    %38 = vector.multi_reduction <add>, %37, %cst_12 [0] : vector<8x1xf32> to vector<1xf32>
    %39 = vector.shape_cast %38 : vector<1xf32> to vector<1x1xf32>
    %40 = vector.broadcast %39 : vector<1x1xf32> to vector<8x1xf32>
    %41 = arith.divf %37, %40 : vector<8x1xf32>
    %42 = vector.broadcast %41 : vector<8x1xf32> to vector<8x512xf32>
    %43 = arith.mulf %42, %0 : vector<8x512xf32>
    %cst_13 = arith.constant dense<0.000000e+00> : vector<512xf32>
    %44 = vector.multi_reduction <add>, %43, %cst_13 [0] : vector<8x512xf32> to vector<512xf32>
    %45 = vector.shape_cast %44 : vector<512xf32> to vector<1x512xf32>
    %c0_14 = arith.constant 0 : index
    %c0_15 = arith.constant 0 : index
    %46 = vector.load %arg7[%c0_14, %c0_15] : memref<1x512xf32, #tpu.memory_space<vmem>>, vector<1x512xf32>
    tpu.vector_store %arg7[%c0_14, %c0_15], %45 {strides = array<i32>} : memref<1x512xf32, #tpu.memory_space<vmem>>, vector<1x512xf32>,
    %47 = vector.broadcast %41 : vector<8x1xf32> to vector<8x2xf32>
    %48 = arith.mulf %47, %5 : vector<8x2xf32>
    %cst_16 = arith.constant dense<0.000000e+00> : vector<2xf32>
    %49 = vector.multi_reduction <add>, %48, %cst_16 [0] : vector<8x2xf32> to vector<2xf32>
    %50 = vector.shape_cast %49 : vector<2xf32> to vector<1x2xf32>
    %cst_17 = arith.constant dense<0xFF800000> : vector<1xf32>
    %51 = vector.multi_reduction <maximumf>, %50, %cst_17 [1] : vector<1x2xf32> to vector<1xf32>
    %52 = vector.shape_cast %51 : vector<1xf32> to vector<1x1xf32>
    %53 = vector.broadcast %52 : vector<1x1xf32> to vector<1x2xf32>
    %54 = arith.subf %50, %53 : vector<1x2xf32>
    %55 = math.exp %54 : vector<1x2xf32>
    %cst_18 = arith.constant dense<0.000000e+00> : vector<1xf32>
    %56 = vector.multi_reduction <add>, %55, %cst_18 [1] : vector<1x2xf32> to vector<1xf32>
    %57 = vector.shape_cast %56 : vector<1xf32> to vector<1x1xf32>
    %58 = math.log %57 : vector<1x1xf32>
    %59 = vector.broadcast %58 : vector<1x1xf32> to vector<1x2xf32>
    %60 = arith.subf %54, %59 : vector<1x2xf32>
    %c0_19 = arith.constant 0 : index
    %c0_20 = arith.constant 0 : index
    %61 = vector.load %arg5[%c0_19, %c0_20] : memref<1x2xf32, #tpu.memory_space<vmem>>, vector<1x2xf32>
    %cst_21 = arith.constant dense<0.000000e+00> : vector<1xf32>
    %62 = vector.multi_reduction <add>, %61, %cst_21 [1] : vector<1x2xf32> to vector<1xf32>
    %63 = vector.shape_cast %62 : vector<1xf32> to vector<1x1xf32>
    %64 = tpu.iota {dimensions = array<i32: 1>} : vector<1x2xi32>
    %65 = arith.sitofp %64 : vector<1x2xi32> to vector<1x2xf32>
    %cst_22 = arith.constant dense<0xFF800000> : vector<1xf32>
    %66 = vector.multi_reduction <maximumf>, %61, %cst_22 [1] : vector<1x2xf32> to vector<1xf32>
    %67 = vector.shape_cast %66 : vector<1xf32> to vector<1x1xf32>
    %68 = vector.broadcast %67 : vector<1x1xf32> to vector<1x2xf32>
    %69 = arith.cmpf oeq, %61, %68 : vector<1x2xf32>
    %cst_23 = arith.constant 2.000000e+00 : f32
    %70 = vector.broadcast %cst_23 : f32 to vector<1x2xf32>
    %71 = arith.select %69, %65, %70 : vector<1x2xi1>, vector<1x2xf32>
    %cst_24 = arith.constant dense<0x7F800000> : vector<1xf32>
    %72 = vector.multi_reduction <minimumf>, %71, %cst_24 [1] : vector<1x2xf32> to vector<1xf32>
    %73 = vector.shape_cast %72 : vector<1xf32> to vector<1x1xf32>
    %74 = vector.broadcast %73 : vector<1x1xf32> to vector<1x2xf32>
    %75 = arith.cmpf oeq, %65, %74 : vector<1x2xf32>
    %76 = arith.extui %75 : vector<1x2xi1> to vector<1x2xi32>
    %77 = arith.sitofp %76 : vector<1x2xi32> to vector<1x2xf32>
    %78 = vector.broadcast %77 : vector<1x2xf32> to vector<8x2xf32>
    %79 = arith.mulf %24, %78 : vector<8x2xf32>
    %cst_25 = arith.constant dense<0.000000e+00> : vector<8xf32>
    %80 = vector.multi_reduction <add>, %79, %cst_25 [1] : vector<8x2xf32> to vector<8xf32>
    %81 = vector.shape_cast %80 : vector<8xf32> to vector<8x1xf32>
    %82 = tpu.iota {dimensions = array<i32: 0>} : vector<8x1xi32>
    %83 = arith.sitofp %82 : vector<8x1xi32> to vector<8x1xf32>
    %cst_26 = arith.constant dense<0xFF800000> : vector<1xf32>
    %84 = vector.multi_reduction <maximumf>, %81, %cst_26 [0] : vector<8x1xf32> to vector<1xf32>
    %85 = vector.shape_cast %84 : vector<1xf32> to vector<1x1xf32>
    %86 = vector.broadcast %85 : vector<1x1xf32> to vector<8x1xf32>
    %87 = arith.cmpf oeq, %81, %86 : vector<8x1xf32>
    %cst_27 = arith.constant 8.000000e+00 : f32
    %88 = vector.broadcast %cst_27 : f32 to vector<8x1xf32>
    %89 = arith.select %87, %83, %88 : vector<8x1xi1>, vector<8x1xf32>
    %cst_28 = arith.constant dense<0x7F800000> : vector<1xf32>
    %90 = vector.multi_reduction <minimumf>, %89, %cst_28 [0] : vector<8x1xf32> to vector<1xf32>
    %91 = vector.shape_cast %90 : vector<1xf32> to vector<1x1xf32>
    %92 = vector.broadcast %91 : vector<1x1xf32> to vector<8x1xf32>
    %93 = arith.cmpf oeq, %83, %92 : vector<8x1xf32>
    %94 = arith.extui %93 : vector<8x1xi1> to vector<8x1xi32>
    %95 = arith.sitofp %94 : vector<8x1xi32> to vector<8x1xf32>
    %96 = vector.broadcast %95 : vector<8x1xf32> to vector<8x512xf32>
    %97 = arith.mulf %0, %96 : vector<8x512xf32>
    %cst_29 = arith.constant dense<0.000000e+00> : vector<512xf32>
    %98 = vector.multi_reduction <add>, %97, %cst_29 [0] : vector<8x512xf32> to vector<512xf32>
    %99 = vector.shape_cast %98 : vector<512xf32> to vector<1x512xf32>
    %c0_30 = arith.constant 0 : index
    %c0_31 = arith.constant 0 : index
    %100 = vector.load %arg3[%c0_30, %c0_31] : memref<2x512xf32, #tpu.memory_space<vmem>>, vector<2x512xf32>
    %101 = tpu.iota {dimensions = array<i32: 0>} : vector<2x1xi32>
    %102 = arith.sitofp %101 : vector<2x1xi32> to vector<2x1xf32>
    %103 = vector.broadcast %73 : vector<1x1xf32> to vector<2x1xf32>
    %104 = arith.cmpf oeq, %102, %103 : vector<2x1xf32>
    %105 = arith.extui %104 : vector<2x1xi1> to vector<2x1xi32>
    %106 = arith.sitofp %105 : vector<2x1xi32> to vector<2x1xf32>
    %107 = vector.broadcast %106 : vector<2x1xf32> to vector<2x512xf32>
    %108 = arith.mulf %100, %107 : vector<2x512xf32>
    %cst_32 = arith.constant dense<0.000000e+00> : vector<512xf32>
    %109 = vector.multi_reduction <add>, %108, %cst_32 [0] : vector<2x512xf32> to vector<512xf32>
    %110 = vector.shape_cast %109 : vector<512xf32> to vector<1x512xf32>
    %cst_33 = arith.constant 9.900000e-01 : f32
    %111 = vector.broadcast %cst_33 : f32 to vector<1x512xf32>
    %112 = arith.mulf %111, %110 : vector<1x512xf32>
    %cst_34 = arith.constant 0.00999999977 : f32
    %113 = vector.broadcast %cst_34 : f32 to vector<1x512xf32>
    %114 = arith.mulf %113, %99 : vector<1x512xf32>
    %115 = arith.addf %112, %114 : vector<1x512xf32>
    %116 = arith.mulf %115, %115 : vector<1x512xf32>
    %cst_35 = arith.constant dense<0.000000e+00> : vector<1xf32>
    %117 = vector.multi_reduction <add>, %116, %cst_35 [1] : vector<1x512xf32> to vector<1xf32>
    %118 = vector.shape_cast %117 : vector<1xf32> to vector<1x1xf32>
    %119 = math.sqrt %118 : vector<1x1xf32>
    %cst_36 = arith.constant 9.99999996E-13 : f32
    %120 = vector.broadcast %cst_36 : f32 to vector<1x1xf32>
    %121 = arith.maximumf %119, %120 : vector<1x1xf32>
    %122 = vector.broadcast %121 : vector<1x1xf32> to vector<1x512xf32>
    %123 = arith.divf %115, %122 : vector<1x512xf32>
    %124 = arith.cmpf one, %123, %123 : vector<1x512xf32>
    %cst_37 = arith.constant 1.000000e+00 : f32
    %cst_38 = arith.constant 0.000000e+00 : f32
    %125 = vector.broadcast %cst_37 : f32 to vector<1x512xf32>
    %126 = vector.broadcast %cst_38 : f32 to vector<1x512xf32>
    %127 = arith.select %124, %125, %126 : vector<1x512xi1>, vector<1x512xf32>
    %cst_39 = arith.constant dense<0.000000e+00> : vector<1xf32>
    %128 = vector.multi_reduction <add>, %127, %cst_39 [1] : vector<1x512xf32> to vector<1xf32>
    %129 = vector.shape_cast %128 : vector<1xf32> to vector<1x1xf32>
    %cst_40 = arith.constant 0.000000e+00 : f32
    %130 = vector.broadcast %cst_40 : f32 to vector<1x1xf32>
    %131 = arith.cmpf ogt, %129, %130 : vector<1x1xf32>
    %cst_41 = arith.constant dense<0.000000e+00> : vector<512xf32>
    %132 = vector.multi_reduction <add>, %0, %cst_41 [0] : vector<8x512xf32> to vector<512xf32>
    %133 = vector.shape_cast %132 : vector<512xf32> to vector<1x512xf32>
    %cst_42 = arith.constant 8.000000e+00 : f32
    %134 = vector.broadcast %cst_42 : f32 to vector<1x512xf32>
    %135 = arith.divf %133, %134 : vector<1x512xf32>
    %136 = vector.shape_cast %131 : vector<1x1xi1> to vector<1x1xi1>
    %137 = vector.broadcast %136 : vector<1x1xi1> to vector<1x512xi1>
    %138 = arith.select %137, %135, %123 : vector<1x512xi1>, vector<1x512xf32>
    %cst_43 = arith.constant 0.000000e+00 : f32
    %139 = vector.broadcast %cst_43 : f32 to vector<1x1xf32>
    %140 = arith.cmpf oge, %63, %139 : vector<1x1xf32>
    %141 = vector.broadcast %140 : vector<1x1xi1> to vector<2x1xi1>
    %142 = arith.andi %104, %141 : vector<2x1xi1>
    %143 = vector.shape_cast %142 : vector<2x1xi1> to vector<2x1xi1>
    %144 = vector.broadcast %143 : vector<2x1xi1> to vector<2x512xi1>
    %145 = vector.shape_cast %138 : vector<1x512xf32> to vector<1x512xf32>
    %146 = vector.broadcast %145 : vector<1x512xf32> to vector<2x512xf32>
    %147 = arith.select %144, %146, %100 : vector<2x512xi1>, vector<2x512xf32>
    %c0_44 = arith.constant 0 : index
    %c0_45 = arith.constant 0 : index
    %148 = vector.load %arg8[%c0_44, %c0_45] : memref<2x512xf32, #tpu.memory_space<vmem>>, vector<2x512xf32>
    tpu.vector_store %arg8[%c0_44, %c0_45], %147 {strides = array<i32>} : memref<2x512xf32, #tpu.memory_space<vmem>>, vector<2x512xf32>,
    %cst_46 = arith.constant 0.000000e+00 : f32
    %149 = vector.broadcast %cst_46 : f32 to vector<8x128xf32>
    %c0_47 = arith.constant 0 : index
    %c0_48 = arith.constant 0 : index
    %150 = vector.load %arg6[%c0_47, %c0_48] : memref<8x128xf32, #tpu.memory_space<vmem>>, vector<8x128xf32>
    tpu.vector_store %arg6[%c0_47, %c0_48], %149 {strides = array<i32>} : memref<8x128xf32, #tpu.memory_space<vmem>>, vector<8x128xf32>,
    %c0_49 = arith.constant 0 : index
    %c0_50 = arith.constant 0 : index
    %151 = vector.load %arg6[%c0_49, %c0_50] : memref<8x128xf32, #tpu.memory_space<vmem>>, vector<8x2xf32>
    tpu.vector_store %arg6[%c0_49, %c0_50], %15 {strides = array<i32>} : memref<8x128xf32, #tpu.memory_space<vmem>>, vector<8x2xf32>,
    %c0_51 = arith.constant 0 : index
    %c2 = arith.constant 2 : index
    %152 = vector.load %arg6[%c0_51, %c2] : memref<8x128xf32, #tpu.memory_space<vmem>>, vector<1x2xf32>
    tpu.vector_store %arg6[%c0_51, %c2], %60 {strides = array<i32>} : memref<8x128xf32, #tpu.memory_space<vmem>>, vector<1x2xf32>,
    %c0_52 = arith.constant 0 : index
    %c4 = arith.constant 4 : index
    %153 = vector.load %arg6[%c0_52, %c4] : memref<8x128xf32, #tpu.memory_space<vmem>>, vector<8x1xf32>
    tpu.vector_store %arg6[%c0_52, %c4], %41 {strides = array<i32>} : memref<8x128xf32, #tpu.memory_space<vmem>>, vector<8x1xf32>,
    return
  }
}

</mosaic_0001>

<bundles_post_ra>
// kernel: psmil_forward.1
= control target key start
LH: loop header
LB: loop body
LE: loop exit
PB: predicated region body
PF: predicated region fallthrough
CT: control target
= control target key end

     0   :  { %s1168_s0 = inlined_call_operand.<no memory space> [shape: f32[1], index: 0, kind: input, shape index: {}]   ;;  %s1169_s1 = inlined_call_operand.vmem [shape: f32[8,512], index: 1, kind: input, shape index: {}]   ;;  %s1170_s2 = inlined_call_operand.vmem [shape: f32[512,4], index: 2, kind: input, shape index: {}]   ;;  %s1171_s3 = inlined_call_operand.vmem [shape: f32[2,512], index: 3, kind: input, shape index: {}, may-alias: {3,8}]   ;;  %s1172_s4 = inlined_call_operand.vmem [shape: f32[1,2], index: 4, kind: input, shape index: {}]   ;;  %s1173_s5 = inlined_call_operand.vmem [shape: f32[1,2], index: 5, kind: input, shape index: {}]   ;;  %s1174_s6 = inlined_call_operand.vmem [shape: f32[8,128], index: 6, kind: output, shape index: {0}]   ;;  %s1175_s7 = inlined_call_operand.hbm [shape: f32[1,512], index: 7, kind: output, shape index: {1}]   ;;  %s1176_s8 = inlined_call_operand.vmem [shape: f32[2,512], index: 8, kind: output, shape index: {2}, may-alias: {3,8}]  }
   0x1   :  { %v46_v0 = vld [vmem:[%s1170_s2 + $0x70] sm:$0xff]  ;;  %v47_v1 = vld [vmem:[%s1170_s2 + $0x78] sm:$0xff]  ;;  %v44_v11 = vld [vmem:[%s1170_s2 + $0x60] sm:$0xff] }
   0x2   :  { %v62_v2 = vld [vmem:[%s1170_s2 + $0xf0] sm:$0xff]  ;;  %v107_v3 = vpack.c.bf16 %v47_v1, %v46_v0  ;;  %v63_v4 = vld [vmem:[%s1170_s2 + $0xf8] sm:$0xff]  ;;  %v45_v13 = vld [vmem:[%s1170_s2 + $0x68] sm:$0xff] }
   0x3   :  { %v78_v5 = vld [vmem:[%s1170_s2 + $0x170] sm:$0xff]  ;;  %v79_v6 = vld [vmem:[%s1170_s2 + $0x178] sm:$0xff]  ;;  %v115_v7 = vpack.c.bf16 %v63_v4, %v62_v2  ;;  %v60_v14 = vld [vmem:[%s1170_s2 + $0xe0] sm:$0xff]  ;;  %v106_v16 = vpack.c.bf16 %v45_v13, %v44_v11 }
   0x4   :  { %v123_v8 = vpack.c.bf16 %v79_v6, %v78_v5  ;;  %v94_v9 = vld [vmem:[%s1170_s2 + $0x1f0] sm:$0xff]  ;;  %v95_v10 = vld [vmem:[%s1170_s2 + $0x1f8] sm:$0xff]  ;;  %132 = vmatpush.bf16.msra.mxu0 %v107_v3  ;;  %v61_v15 = vld [vmem:[%s1170_s2 + $0xe8] sm:$0xff] }
   0x5   :  { %v131_v12 = vpack.c.bf16 %v95_v10, %v94_v9  ;;  %145 = vmatpush.bf16.msra.mxu1 %v115_v7  ;;  %v114_v17 = vpack.c.bf16 %v61_v15, %v60_v14  ;;  %v76_v18 = vld [vmem:[%s1170_s2 + $0x160] sm:$0xff]  ;;  %v77_v19 = vld [vmem:[%s1170_s2 + $0x168] sm:$0xff]  ;;  %v42_v23 = vld [vmem:[%s1170_s2 + $0x50] sm:$0xff] }
   0x6   :  { %158 = vmatpush.bf16.msra.mxu2 %v123_v8  ;;  %v92_v20 = vld [vmem:[%s1170_s2 + $0x1e0] sm:$0xff]  ;;  %v122_v21 = vpack.c.bf16 %v77_v19, %v76_v18  ;;  %v93_v22 = vld [vmem:[%s1170_s2 + $0x1e8] sm:$0xff]  ;;  %v43_v24 = vld [vmem:[%s1170_s2 + $0x58] sm:$0xff] }
   0x7   :  { %171 = vmatpush.bf16.msra.mxu3 %v131_v12  ;;  %v130_v25 = vpack.c.bf16 %v93_v22, %v92_v20  ;;  %v58_v26 = vld [vmem:[%s1170_s2 + $0xd0] sm:$0xff]  ;;  %v59_v27 = vld [vmem:[%s1170_s2 + $0xd8] sm:$0xff]  ;;  %v105_v29 = vpack.c.bf16 %v43_v24, %v42_v23  ;;  %v40_v35 = vld [vmem:[%s1170_s2 + $0x40] sm:$0xff] }
   0x8   :  { %v74_v28 = vld [vmem:[%s1170_s2 + $0x150] sm:$0xff]  ;;  %133 = vmatpush.bf16.msra.mxu0 %v106_v16  ;;  %v75_v30 = vld [vmem:[%s1170_s2 + $0x158] sm:$0xff]  ;;  %v113_v33 = vpack.c.bf16 %v59_v27, %v58_v26  ;;  %v41_v36 = vld [vmem:[%s1170_s2 + $0x48] sm:$0xff] }
   0x9   :  { %v90_v31 = vld [vmem:[%s1170_s2 + $0x1d0] sm:$0xff]  ;;  %v91_v32 = vld [vmem:[%s1170_s2 + $0x1d8] sm:$0xff]  ;;  %146 = vmatpush.bf16.msra.mxu1 %v114_v17  ;;  %v121_v34 = vpack.c.bf16 %v75_v30, %v74_v28  ;;  %v56_v37 = vld [vmem:[%s1170_s2 + $0xc0] sm:$0xff]  ;;  %v104_v44 = vpack.c.bf16 %v41_v36, %v40_v35 }
   0xa   :  { %159 = vmatpush.bf16.msra.mxu2 %v122_v21  ;;  %v129_v38 = vpack.c.bf16 %v91_v32, %v90_v31  ;;  %v57_v39 = vld [vmem:[%s1170_s2 + $0xc8] sm:$0xff]  ;;  %v72_v40 = vld [vmem:[%s1170_s2 + $0x140] sm:$0xff]  ;;  %v38_v47 = vld [vmem:[%s1170_s2 + $0x30] sm:$0xff] }
   0xb   :  { %172 = vmatpush.bf16.msra.mxu3 %v130_v25  ;;  %v73_v41 = vld [vmem:[%s1170_s2 + $0x148] sm:$0xff]  ;;  %v88_v42 = vld [vmem:[%s1170_s2 + $0x1c0] sm:$0xff]  ;;  %v112_v45 = vpack.c.bf16 %v57_v39, %v56_v37  ;;  %v39_v48 = vld [vmem:[%s1170_s2 + $0x38] sm:$0xff] }
   0xc   :  { %v89_v43 = vld [vmem:[%s1170_s2 + $0x1c8] sm:$0xff]  ;;  %134 = vmatpush.bf16.msra.mxu0 %v105_v29  ;;  %v120_v46 = vpack.c.bf16 %v73_v41, %v72_v40  ;;  %v54_v49 = vld [vmem:[%s1170_s2 + $0xb0] sm:$0xff]  ;;  %v55_v51 = vld [vmem:[%s1170_s2 + $0xb8] sm:$0xff]  ;;  %v103_v56 = vpack.c.bf16 %v39_v48, %v38_v47 }
   0xd   :  { %147 = vmatpush.bf16.msra.mxu1 %v113_v33  ;;  %v128_v50 = vpack.c.bf16 %v89_v43, %v88_v42  ;;  %v70_v52 = vld [vmem:[%s1170_s2 + $0x130] sm:$0xff]  ;;  %v71_v53 = vld [vmem:[%s1170_s2 + $0x138] sm:$0xff]  ;;  %v111_v57 = vpack.c.bf16 %v55_v51, %v54_v49  ;;  %v36_v59 = vld [vmem:[%s1170_s2 + $0x20] sm:$0xff] }
   0xe   :  { %160 = vmatpush.bf16.msra.mxu2 %v121_v34  ;;  %v86_v54 = vld [vmem:[%s1170_s2 + $0x1b0] sm:$0xff]  ;;  %v87_v55 = vld [vmem:[%s1170_s2 + $0x1b8] sm:$0xff]  ;;  %v119_v58 = vpack.c.bf16 %v71_v53, %v70_v52  ;;  %v37_v60 = vld [vmem:[%s1170_s2 + $0x28] sm:$0xff] }
   0xf   :  { %173 = vmatpush.bf16.msra.mxu3 %v129_v38  ;;  %v52_v61 = vld [vmem:[%s1170_s2 + $0xa0] sm:$0xff]  ;;  %v127_v62 = vpack.c.bf16 %v87_v55, %v86_v54  ;;  %v53_v63 = vld [vmem:[%s1170_s2 + $0xa8] sm:$0xff]  ;;  %v102_v4 = vpack.c.bf16 %v37_v60, %v36_v59  ;;  %v34_v7 = vld [vmem:[%s1170_s2 + $0x10] sm:$0xff] }
  0x10   :  { %135 = vmatpush.bf16.msra.mxu0 %v104_v44  ;;  %v68_v0 = vld [vmem:[%s1170_s2 + $0x120] sm:$0xff]  ;;  %v69_v1 = vld [vmem:[%s1170_s2 + $0x128] sm:$0xff]  ;;  %v110_v5 = vpack.c.bf16 %v53_v63, %v52_v61  ;;  %v35_v8 = vld [vmem:[%s1170_s2 + $0x18] sm:$0xff] }
  0x11   :  { %148 = vmatpush.bf16.msra.mxu1 %v112_v45  ;;  %v84_v2 = vld [vmem:[%s1170_s2 + $0x1a0] sm:$0xff]  ;;  %v85_v3 = vld [vmem:[%s1170_s2 + $0x1a8] sm:$0xff]  ;;  %v118_v6 = vpack.c.bf16 %v69_v1, %v68_v0  ;;  %v50_v9 = vld [vmem:[%s1170_s2 + $0x90] sm:$0xff]  ;;  %v101_v16 = vpack.c.bf16 %v35_v8, %v34_v7 }
  0x12   :  { %161 = vmatpush.bf16.msra.mxu2 %v120_v46  ;;  %v126_v10 = vpack.c.bf16 %v85_v3, %v84_v2  ;;  %v51_v11 = vld [vmem:[%s1170_s2 + $0x98] sm:$0xff]  ;;  %v66_v12 = vld [vmem:[%s1170_s2 + $0x110] sm:$0xff] }
  0x13   :  { %174 = vmatpush.bf16.msra.mxu3 %v128_v50  ;;  %v67_v13 = vld [vmem:[%s1170_s2 + $0x118] sm:$0xff]  ;;  %v82_v14 = vld [vmem:[%s1170_s2 + $0x190] sm:$0xff] }
  0x14   :  { %136 = vmatpush.bf16.msra.mxu0 %v103_v56  ;;  %v83_v15 = vld [vmem:[%s1170_s2 + $0x198] sm:$0xff] }
  0x15   :  { %149 = vmatpush.bf16.msra.mxu1 %v111_v57 }
  0x16   :  { %162 = vmatpush.bf16.msra.mxu2 %v119_v58 }
  0x17   :  { %175 = vmatpush.bf16.msra.mxu3 %v127_v62 }
  0x18   :  { %137 = vmatpush.bf16.msra.mxu0 %v102_v4 }
  0x19   :  { %15 = vsyncpa [#allocation4], 0  ;;  %150 = vmatpush.bf16.msra.mxu1 %v110_v5  ;;  %v109_v17 = vpack.c.bf16 %v51_v11, %v50_v9  ;;  %v117_v18 = vpack.c.bf16 %v67_v13, %v66_v12  ;;  %v32_v19 = vld [vmem:[%s1170_s2] sm:$0xff]  ;;  %v33_v20 = vld [vmem:[%s1170_s2 + $0x8] sm:$0xff]  ;;  %v125_v22 = vpack.c.bf16 %v83_v15, %v82_v14  ;;  %vm209_vm0 = vcmask 31760   ;;  %s719_s13 = smov 2  }
  0x1a   :  { %163 = vmatpush.bf16.msra.mxu2 %v118_v6  ;;  %v48_v21 = vld [vmem:[%s1170_s2 + $0x80] sm:$0xff]  ;;  %v49_v23 = vld [vmem:[%s1170_s2 + $0x88] sm:$0xff]  ;;  %v100_v28 = vpack.c.bf16 %v33_v20, %v32_v19  ;;  %v974_v33 = vld [vmem:[%s1169_s1 + $0x10] sm:$0xff]  ;;  %vm353_vm1 = vcmask 8192   ;;  %v327_v54 = vlaneseq  ;;  %v718_v0 = vmov 0.0   ;;  %s643_s17 = sshll.u32 %s1175_s7, 4  ;;  %s644_s17 = int_to_ptr.hbm [resolvable:$true] %s643_s17 }
  0x1b   :  { %176 = vmatpush.bf16.msra.mxu3 %v126_v10  ;;  %v64_v24 = vld [vmem:[%s1170_s2 + $0x100] sm:$0xff]  ;;  %v65_v25 = vld [vmem:[%s1170_s2 + $0x108] sm:$0xff]  ;;  %v108_v30 = vpack.c.bf16 %v49_v23, %v48_v21  ;;  %v979_v35 = vld [vmem:[%s1169_s1 + $0x18] sm:$0xff]  ;;  %v98_v38 = vpack.c.bf16 %v974_v33, %v974_v33  ;;  %624 = vst [vmem:[%s1174_s6] sm:$0xff] %v718_v0  ;;  %v720_v3 = vmov 269488144   ;;  %vm184_vm3 = vcmask 15360  }
  0x1c   :  { %v80_v26 = vld [vmem:[%s1170_s2 + $0x180] sm:$0xff]  ;;  %v81_v27 = vld [vmem:[%s1170_s2 + $0x188] sm:$0xff]  ;;  %138 = vmatpush.bf16.msra.mxu0 %v101_v16  ;;  %v116_v31 = vpack.c.bf16 %v65_v25, %v64_v24  ;;  %v99_v39 = vpack.c.bf16 %v979_v35, %v979_v35  ;;  %v358_v57 = vand.u32 127, %v327_v54  ;;  %v385_v2 = vshrl.u32 %v327_v54, 7  ;;  %s721_s18 = smov [#allocation3]  }
  0x1d   :  { %v964_v29 = vld [vmem:[%s1169_s1] sm:$0xff]  ;;  %151 = vmatpush.bf16.msra.mxu1 %v109_v17  ;;  %v969_v32 = vld [vmem:[%s1169_s1 + $0x8] sm:$0xff]  ;;  %v124_v34 = vpack.c.bf16 %v81_v27, %v80_v26  ;;  %v439_v4 = vunpack.c.l.s4 %v720_v3  ;;  %vm324_vm10 = vcmask 1041408   ;;  %s641_s19 = sshll.u32 %s721_s18, 4  ;;  %s642_s19 = int_to_ptr.vmem [resolvable:$true] %s641_s19 }
  0x1e   :  { %164 = vmatpush.bf16.msra.mxu2 %v117_v18  ;;  %v96_v36 = vpack.c.bf16 %v964_v29, %v964_v29  ;;  %v97_v37 = vpack.c.bf16 %v969_v32, %v969_v32  ;;  %v995_v51 = vld [vmem:[%s1173_s5] sm:$0x1]  ;;  %v359_v59 = vcvt.s32.f32 %v358_v57  ;;  %s717_s5 = smov 126   ;;  %v1013_v6 = vcvt.s32.f32 %v385_v2 }
  0x1f   :  { %177 = vmatpush.bf16.msra.mxu3 %v125_v22  ;;  %v360_v53 = vsel %vm353_vm1, %v995_v51, -inf  ;;  %v668_v1 = vld [vmem:[%s1172_s4] ss:$0 sm:$0xff]  ;;  %v440_v9 = vunpack.c.0.s8 %v439_v4 }
  0x20   :  { %139 = vmatpush.bf16.msra.mxu0 %v100_v28  ;;  %v432_v14 = vld [vmem:[%s1171_s3] sm:$0xff] }
  0x21   :  { %152 = vmatpush.bf16.msra.mxu1 %v108_v30 }
  0x22   :  { %165 = vmatpush.bf16.msra.mxu2 %v116_v31 }
  0x23   :  { %178 = vmatpush.bf16.msra.mxu3 %v124_v34  ;;  %140 = vmatmul.bf16.vlgmr.msra.gmra.mxu0 %v96_v36 }
  0x24   :  { %153 = vmatmul.bf16.vlgmr.msra.gmra.mxu1 %v97_v37 }
  0x25   :  { %166 = vmatmul.bf16.vlgmr.msra.gmra.mxu2 %v98_v38 }
  0x26   :  { %179 = vmatmul.bf16.vlgmr.msra.gmra.mxu3 %v99_v39 }
  0xa0   :  { %v141_v40 = vpop.f32.mrf.mxu0 }
  0xa1   :  { %v154_v41 = vpop.f32.mrf.mxu1 }
  0xa2   :  { %v155_v42 = vadd.f32 %v154_v41, %v141_v40 }
  0xa8   :  { %v167_v43 = vpop.f32.mrf.mxu2  ;;  %v143_v46 = vpop.f32.mrf.mxu0 }
  0xa9   :  { %v168_v44 = vadd.f32 %v167_v43, %v155_v42  ;;  %v180_v45 = vpop.f32.mrf.mxu3  ;;  %v156_v47 = vpop.f32.mrf.mxu1  ;;  %v253_v46 = vstv %s1168_s0 }
  0xab   :  { %v989_v48 = vadd.f32 %v180_v45, %v168_v44 }
  0xad   :  { %v210_v49 = vsel %vm209_vm0, %v989_v48, -inf }
  0xae   :  { %211 = vmax.xlane.f32.xlu0 %v210_v49 }
  0xb0   :  { %v169_v50 = vpop.f32.mrf.mxu2 }
  0xb1   :  { %v182_v52 = vpop.f32.mrf.mxu3 }
  0xb6   :  { %361 = vmax.xlane.f32.xlu0 %v360_v53 }
 0x121   :  { %v212_v55 = vpop.xlane.xlu0 %211 }
 0x122   :  { %v213_v56 = vsub.f32 %v989_v48, %v212_v55 }
 0x124   :  { %v214_v58 = vmul.f32 1.442695, %v213_v56 }
 0x126   :  { %669 = vpow2.f32 %v214_v58 }
 0x129   :  { %v362_v60 = vpop.xlane.xlu0 %361 }
 0x12a   :  { %vm363_vm2 = vcmp.eq.f32.partialorder %v995_v51, %v362_v60 }
 0x12b   :  { %v364_v61 = vsel %vm363_vm2, %v359_v59, 2.0  ;;  %vm320_vm2 = vcmask 1040384  }
 0x12c   :  { %v670_v62 = vpop.eup %669  ;;  %v365_v63 = vsel %vm353_vm1, %v364_v61, inf }
 0x12d   :  { %217 = vrot.lane.b32.xlu1 %v670_v62, %s717_s5  ;;  %366 = vmin.xlane.f32.xlu2 %v365_v63 }
 0x145   :  { %241 = vrot.lane.b32.xlu2 %v668_v1, %s719_s13 }
 0x19f   :  { %v218_v5 = vpop.permute.xlu1 %217 }
 0x1a0   :  { %v220_v7 = vsel %vm184_vm3, %v218_v5, 0.0  ;;  %v367_v8 = vpop.xlane.xlu2 %366 }
 0x1a1   :  { %221 = vadd.xlane.f32.xlu1 %v220_v7  ;;  %vm368_vm4 = vcmp.eq.f32.partialorder %v359_v59, %v367_v8  ;;  %v433_v10 = vperm.slane %v367_v8, 0 }
 0x1a2   :  { %v658_v11 = vsel %vm368_vm4, 1.0, %v718_v0  ;;  %vm322_vm4 = vcmask 1042434  }
 0x1a3   :  { %v371_v12 = vperm.slane %v658_v11, 0  ;;  %vm1018_vm5 = vcmp.eq.f32.partialorder %v1013_v6, %v433_v10 }
 0x1a4   :  { %v660_v15 = vsel %vm1018_vm5, 1.0, %v718_v0 }
 0x1a5   :  { %v441_v16 = vperm.slane %v660_v15, %v440_v9  ;;  %373 = vrot.lane.b32.xlu0 %v371_v12, %s719_s13 }
 0x1a7   :  { %v443_v17 = vmul.f32 %v441_v16, %v432_v14 }
 0x1a8   :  { %v242_v38 = vpop.permute.xlu2 %241 }
 0x1a9   :  { %445 = vst [vmem:[#allocation1] ss:$4 sm:$0xff] %v443_v17 }
 0x1b0   :  { %v446_v18 = vld.sshfl [vmem:[#allocation1] sm:$0xff pattern:$0x73625140]  ;;  %v447_v19 = vld.sshfl [vmem:[#allocation1 + $0x8] sm:$0xff pattern:$0x73625140] }
 0x1b1   :  { %v448_v20 = vld.sshfl [vmem:[#allocation1 + $0x10] sm:$0xff pattern:$0x73625140]  ;;  %v449_v21 = vld.sshfl [vmem:[#allocation1 + $0x18] sm:$0xff pattern:$0x73625140] }
 0x1b2   :  { %597 = vst [vmem:[#allocation1] ss:$4 sm:$0xff] %v432_v14  ;;  %v454_v4 = vsel %vm324_vm10, %v446_v18, 0.0  ;;  %v461_v7 = vsel %vm324_vm10, %v447_v19, 0.0  ;;  %v468_v11 = vsel %vm324_vm10, %v448_v20, 0.0  ;;  %v475_v12 = vsel %vm324_vm10, %v449_v21, 0.0 }
 0x1b3   :  { %v455_v10 = vrot.slane %v454_v4, 4  ;;  %v462_v15 = vrot.slane %v461_v7, 4 }
 0x1b5   :  { %v463_v18 = vadd.f32 %v462_v15, %v461_v7 }
 0x1b7   :  { %v464_v20 = vrot.slane %v463_v18, 2 }
 0x214   :  { %v222_v22 = vpop.xlane.xlu1 %221 }
 0x215   :  { %671 = vrcp.f32 %v222_v22  ;;  %v234_v26 = vand.u32 2147483648, %v222_v22  ;;  %v232_v28 = vand.u32 2147483647, %v222_v22  ;;  %vm228_vm7 = vweird.f32 %v222_v22 }
 0x217   :  { %v235_v31 = vor.u32 1.1754944e-38, %v234_v26  ;;  %vm233_vm9 = vcmp.eq.f32.partialorder %v232_v28, 8.507059e+37  ;;  %v374_v37 = vpop.permute.xlu0 %373 }
 0x21b   :  { %v672_v23 = vpop.eup %671 }
 0x21c   :  { %v224_v24 = vmul.f32 %v672_v23, %v222_v22  ;;  %vm229_vm6 = vweird.f32 %v672_v23  ;;  %v469_v22 = vrot.slane %v468_v11, 4 }
 0x21d   :  { %vm230_vm8 = vmor %vm228_vm7, %vm229_vm6  ;;  %vm329_vm6 = vcmp.lt.s32.totalorder %v327_v54, 512 }
 0x21e   :  { %v225_v25 = vsub.f32 1.0, %v224_v24  ;;  %v470_v26 = vadd.f32 %v469_v22, %v468_v11 }
 0x220   :  { %v226_v27 = vmul.f32 %v672_v23, %v225_v25  ;;  %v456_v25 = vadd.f32 %v455_v10, %v454_v4  ;;  %v471_v21 = vrot.slane %v470_v26, 2 }
 0x222   :  { %v227_v30 = vadd.f32 %v672_v23, %v226_v27 }
 0x224   :  { %v231_v34 = vsel %vm230_vm8, %v672_v23, %v227_v30  ;;  %v476_v23 = vrot.slane %v475_v12, 4  ;;  %v457_v30 = vrot.slane %v456_v25, 2 }
 0x225   :  { %v236_v36 = vsel %vm233_vm9, %v235_v31, %v231_v34 }
 0x226   :  { %v237_v39 = vmul.f32 %v670_v62, %v236_v36  ;;  %v477_v27 = vadd.f32 %v476_v23, %v475_v12 }
 0x228   :  { %v376_v40 = vmul.f32 %v374_v37, %v237_v39  ;;  %v244_v41 = vmul.f32 %v242_v38, %v237_v39  ;;  %v478_v34 = vrot.slane %v477_v27, 2  ;;  %v458_v38 = vadd.f32 %v457_v30, %v456_v25 }
 0x22a   :  { %378 = vrot.lane.b32.xlu0 %v376_v40, %s717_s5  ;;  %246 = vrot.lane.b32.xlu2 %v244_v41, %s717_s5  ;;  %v465_v40 = vadd.f32 %v464_v20, %v463_v18 }
 0x284   :  { %v247_v42 = vpop.permute.xlu2 %246 }
 0x285   :  { %v249_v43 = vsel %vm184_vm3, %v247_v42, 0.0 }
 0x286   :  { %250 = vadd.xlane.f32.xlu2 %v249_v43  ;;  %v472_v43 = vadd.f32 %v471_v21, %v470_v26 }
 0x29c   :  { %v379_v44 = vpop.permute.xlu0 %378 }
 0x29d   :  { %v381_v45 = vsel %vm184_vm3, %v379_v44, 0.0  ;;  %v479_v44 = vadd.f32 %v478_v34, %v477_v27 }
 0x29e   :  { %382 = vadd.xlane.f32.xlu0 %v381_v45 }
 0x2f9   :  { %v251_v47 = vpop.xlane.xlu2 %250 }
 0x2fa   :  { %v254_v49 = vadd.f32 %v253_v46, %v251_v47  ;;  %v459_v47 = vrot.slane %v458_v38, 1 }
 0x2fc   :  { %v255_v50 = vrot.slane %v254_v49, 4 }
 0x2fe   :  { %v256_v52 = vmax.f32 %v254_v49, %v255_v50 }
 0x300   :  { %v257_v53 = vrot.slane %v256_v52, 2 }
 0x302   :  { %v258_v55 = vmax.f32 %v256_v52, %v257_v53  ;;  %v466_v52 = vrot.slane %v465_v40, 1 }
 0x304   :  { %v259_v56 = vrot.slane %v258_v55, 1 }
 0x306   :  { %v260_v57 = vmax.f32 %v258_v55, %v259_v56  ;;  %v473_v56 = vrot.slane %v472_v43, 1 }
 0x308   :  { %v261_v58 = vsub.f32 %v254_v49, %v260_v57  ;;  %v480_v57 = vrot.slane %v479_v44, 1 }
 0x30a   :  { %v262_v59 = vmul.f32 1.442695, %v261_v58 }
 0x30c   :  { %673 = vpow2.f32 %v262_v59  ;;  %v460_v59 = vadd.f32 %v459_v47, %v458_v38 }
 0x30e   :  { %v482_v12 = vmul.f32 0.99, %v460_v59 }
 0x311   :  { %v383_v60 = vpop.xlane.xlu0 %382 }
 0x312   :  { %v1036_v61 = vpop.eup %673  ;;  %v387_v62 = vrot.slane %v383_v60, 4 }
 0x313   :  { %v264_v63 = vrot.slane %v1036_v61, 4 }
 0x314   :  { %v388_v1 = vmax.f32 %v383_v60, %v387_v62 }
 0x315   :  { %v265_v2 = vadd.f32 %v1036_v61, %v264_v63  ;;  %v467_v63 = vadd.f32 %v466_v52, %v465_v40 }
 0x316   :  { %v389_v3 = vrot.slane %v388_v1, 2 }
 0x317   :  { %v266_v5 = vrot.slane %v265_v2, 2 }
 0x318   :  { %v390_v8 = vmax.f32 %v388_v1, %v389_v3 }
 0x319   :  { %v267_v9 = vadd.f32 %v266_v5, %v265_v2 }
 0x31a   :  { %v391_v14 = vrot.slane %v390_v8, 1 }
 0x31b   :  { %v268_v16 = vrot.slane %v267_v9, 1 }
 0x31c   :  { %v392_v17 = vmax.f32 %v390_v8, %v391_v14  ;;  %v474_v8 = vadd.f32 %v473_v56, %v472_v43 }
 0x31d   :  { %v269_v24 = vadd.f32 %v268_v16, %v267_v9 }
 0x31e   :  { %vm393_vm11 = vcmp.eq.f32.partialorder %v383_v60, %v392_v17  ;;  %v484_v52 = vmul.f32 0.99, %v474_v8 }
 0x31f   :  { %675 = vrcp.f32 %v269_v24  ;;  %v394_v19 = vsel %vm393_vm11, %v1013_v6, 8.0  ;;  %v281_v45 = vand.u32 2147483648, %v269_v24  ;;  %v279_v50 = vand.u32 2147483647, %v269_v24 }
 0x320   :  { %v395_v28 = vrot.slane %v394_v19, 4  ;;  %vm275_vm13 = vweird.f32 %v269_v24 }
 0x321   :  { %v282_v58 = vor.u32 1.1754944e-38, %v281_v45  ;;  %vm280_vm0 = vcmp.eq.f32.partialorder %v279_v50, 8.507059e+37 }
 0x322   :  { %v396_v31 = vmin.f32 %v394_v19, %v395_v28  ;;  %v483_v19 = vmul.f32 0.99, %v467_v63 }
 0x324   :  { %v397_v37 = vrot.slane %v396_v31, 2 }
 0x325   :  { %v676_v36 = vpop.eup %675 }
 0x326   :  { %v271_v39 = vmul.f32 %v676_v36, %v269_v24  ;;  %v398_v41 = vmin.f32 %v396_v31, %v397_v37  ;;  %vm276_vm12 = vweird.f32 %v676_v36 }
 0x327   :  { %vm277_vm14 = vmor %vm275_vm13, %vm276_vm12 }
 0x328   :  { %v272_v42 = vsub.f32 1.0, %v271_v39  ;;  %v399_v46 = vrot.slane %v398_v41, 1 }
 0x32a   :  { %v273_v49 = vmul.f32 %v676_v36, %v272_v42  ;;  %v400_v53 = vmin.f32 %v398_v41, %v399_v46 }
 0x32c   :  { %v274_v55 = vadd.f32 %v676_v36, %v273_v49  ;;  %vm401_vm15 = vcmp.eq.f32.partialorder %v1013_v6, %v400_v53  ;;  %v481_v6 = vadd.f32 %v480_v57, %v479_v44 }
 0x32d   :  { %v659_v62 = vsel %vm401_vm15, 1.0, %v718_v0 }
 0x32e   :  { %v278_v60 = vsel %vm277_vm14, %v676_v36, %v274_v55  ;;  %v404_v2 = vmul.f32 %v659_v62, %v964_v29  ;;  %v405_v3 = vmul.f32 %v659_v62, %v969_v32  ;;  %v406_v4 = vmul.f32 %v659_v62, %v974_v33 }
 0x32f   :  { %v283_v1 = vsel %vm280_vm0, %v282_v58, %v278_v60  ;;  %v407_v7 = vmul.f32 %v659_v62, %v979_v35 }
 0x330   :  { %v1051_v5 = vmul.f32 %v1036_v61, %v283_v1  ;;  %v408_v9 = vrot.slane %v404_v2, 4  ;;  %v414_v10 = vrot.slane %v405_v3, 4  ;;  %v420_v11 = vrot.slane %v406_v4, 4 }
 0x331   :  { %v426_v15 = vrot.slane %v407_v7, 4 }
 0x332   :  { %v332_v14 = vmul.f32 %v1051_v5, %v989_v48  ;;  %v285_v16 = vmul.f32 %v1051_v5, %v964_v29  ;;  %v286_v17 = vmul.f32 %v1051_v5, %v969_v32  ;;  %v409_v61 = vadd.f32 %v408_v9, %v404_v2 }
 0x333   :  { %v415_v22 = vadd.f32 %v414_v10, %v405_v3  ;;  %v421_v23 = vadd.f32 %v420_v11, %v406_v4  ;;  %v287_v24 = vmul.f32 %v1051_v5, %v974_v33  ;;  %v427_v18 = vadd.f32 %v426_v15, %v407_v7 }
 0x334   :  { %v333_v25 = vsel %vm184_vm3, %v332_v14, 0.0  ;;  %v289_v26 = vrot.slane %v285_v16, 4  ;;  %v410_v28 = vrot.slane %v409_v61, 2  ;;  %v288_v21 = vmul.f32 %v1051_v5, %v979_v35 }
 0x335   :  { %v334_v27 = vrot.slane %v333_v25, 4  ;;  %v416_v30 = vrot.slane %v415_v22, 2  ;;  %v422_v20 = vrot.slane %v421_v23, 2  ;;  %v428_v31 = vrot.slane %v427_v18, 2 }
 0x336   :  { %v295_v34 = vrot.slane %v286_v17, 4  ;;  %v301_v36 = vrot.slane %v287_v24, 4  ;;  %v411_v38 = vadd.f32 %v410_v28, %v409_v61  ;;  %v290_v42 = vadd.f32 %v289_v26, %v285_v16 }
 0x337   :  { %v335_v37 = vadd.f32 %v334_v27, %v333_v25  ;;  %v417_v39 = vadd.f32 %v416_v30, %v415_v22  ;;  %v423_v40 = vadd.f32 %v422_v20, %v421_v23  ;;  %v429_v41 = vadd.f32 %v428_v31, %v427_v18 }
 0x338   :  { %v296_v43 = vadd.f32 %v295_v34, %v286_v17  ;;  %v302_v44 = vadd.f32 %v301_v36, %v287_v24  ;;  %v412_v46 = vrot.slane %v411_v38, 1  ;;  %v291_v62 = vrot.slane %v290_v42, 2 }
 0x339   :  { %v336_v45 = vrot.slane %v335_v37, 2  ;;  %v418_v47 = vrot.slane %v417_v39, 1  ;;  %v424_v49 = vrot.slane %v423_v40, 1  ;;  %v430_v50 = vrot.slane %v429_v41, 1 }
 0x33a   :  { %v297_v53 = vrot.slane %v296_v43, 2  ;;  %v303_v55 = vrot.slane %v302_v44, 2  ;;  %v413_v57 = vadd.f32 %v412_v46, %v411_v38  ;;  %v307_v7 = vrot.slane %v288_v21, 4 }
 0x33b   :  { %v337_v56 = vadd.f32 %v336_v45, %v335_v37  ;;  %v419_v58 = vadd.f32 %v418_v47, %v417_v39  ;;  %v425_v59 = vadd.f32 %v424_v49, %v423_v40  ;;  %v431_v60 = vadd.f32 %v430_v50, %v429_v41 }
 0x33c   :  { %v298_v63 = vadd.f32 %v297_v53, %v296_v43  ;;  %v304_v1 = vadd.f32 %v303_v55, %v302_v44  ;;  %v486_v3 = vmul.f32 0.01, %v413_v57  ;;  %v485_v15 = vmul.f32 0.99, %v481_v6 }
 0x33d   :  { %v338_v2 = vrot.slane %v337_v56, 1  ;;  %v487_v4 = vmul.f32 0.01, %v419_v58  ;;  %v488_v9 = vmul.f32 0.01, %v425_v59  ;;  %v292_v61 = vadd.f32 %v291_v62, %v290_v42 }
 0x33e   :  { %v489_v10 = vmul.f32 0.01, %v431_v60  ;;  %v299_v11 = vrot.slane %v298_v63, 1  ;;  %v1065_v8 = vadd.f32 %v486_v3, %v482_v12  ;;  %v305_v22 = vrot.slane %v304_v1, 1 }
 0x33f   :  { %v339_v14 = vadd.f32 %v338_v2, %v337_v56  ;;  %v1067_v16 = vadd.f32 %v487_v4, %v483_v19  ;;  %v1069_v17 = vadd.f32 %v488_v9, %v484_v52  ;;  %v308_v23 = vadd.f32 %v307_v7, %v288_v21 }
 0x340   :  { %v494_v25 = vmul.f32 %v1065_v8, %v1065_v8  ;;  %v1076_v26 = vadd.f32 %v489_v10, %v485_v15  ;;  %v300_v6 = vadd.f32 %v299_v11, %v298_v63  ;;  %v293_v28 = vrot.slane %v292_v61, 1 }
 0x341   :  { %v340_v24 = vsel %vm184_vm3, %v339_v14, -inf  ;;  %v495_v18 = vmul.f32 %v1067_v16, %v1067_v16  ;;  %v309_v12 = vrot.slane %v308_v23, 2  ;;  %v496_v19 = vmul.f32 %v1069_v17, %v1069_v17 }
 0x342   :  { %341 = vmax.xlane.f32.xlu1 %v340_v24  ;;  %v306_v30 = vadd.f32 %v305_v22, %v304_v1  ;;  %v497_v21 = vmul.f32 %v1076_v26, %v1076_v26  ;;  %v317_v36 = vrot.slane %v300_v6, 7  ;;  %v294_v38 = vadd.f32 %v293_v28, %v292_v61 }
 0x343   :  { %v498_v27 = vadd.f32 %v495_v18, %v494_v25  ;;  %v310_v20 = vadd.f32 %v309_v12, %v308_v23  ;;  %v185_v45 = vsel %vm184_vm3, %v989_v48, -inf  ;;  %v354_v59 = vsel %vm353_vm1, %v995_v51, 0.0 }
 0x344   :  { %v318_v40 = vrot.slane %v306_v30, 6  ;;  %v321_v42 = vsel %vm320_vm2, %v294_v38, %v317_v36  ;;  %v548_v38 = vrot.slane %v964_v29, 4 }
 0x345   :  { %v499_v31 = vadd.f32 %v498_v27, %v496_v19  ;;  %v311_v34 = vrot.slane %v310_v20, 1 }
 0x347   :  { %v500_v37 = vadd.f32 %v499_v31, %v497_v21  ;;  %v312_v39 = vadd.f32 %v311_v34, %v310_v20 }
 0x349   :  { %v319_v41 = vrot.slane %v312_v39, 5  ;;  %v554_v39 = vrot.slane %v969_v32, 4 }
 0x34a   :  { %501 = vadd.xlane.f32.xlu1 %v500_v37  ;;  %v722_v37 = vmov 8.0  }
 0x34b   :  { %v323_v43 = vsel %vm322_vm4, %v318_v40, %v319_v41  ;;  %v560_v40 = vrot.slane %v974_v33, 4  ;;  %v566_v41 = vrot.slane %v979_v35, 4 }
 0x34c   :  { %v325_v44 = vsel %vm324_vm10, %v321_v42, %v323_v43 }
 0x34d   :  { %331 = vst.msk [vmem:[#allocation3] sm:$0xf] %vm329_vm6, %v325_v44  ;;  %v549_v44 = vadd.f32 %v548_v38, %v964_v29 }
 0x34e   :  { %646 = dma.vmem_to_hbm [thread:$0]  %s642_s19, 64, %s644_s17, [#allocation4]  }
 0x352   :  { %186 = vmax.xlane.f32.xlu1 %v185_v45  ;;  %v555_v45 = vadd.f32 %v554_v39, %v969_v32 }
 0x3b5   :  { %v342_v46 = vpop.xlane.xlu1 %341 }
 0x3b6   :  { %v1086_v47 = vsub.f32 %v339_v14, %v342_v46  ;;  %v561_v46 = vadd.f32 %v560_v40, %v974_v33 }
 0x3b8   :  { %v344_v49 = vmul.f32 1.442695, %v1086_v47 }
 0x3ba   :  { %677 = vpow2.f32 %v344_v49 }
 0x3bd   :  { %v502_v50 = vpop.xlane.xlu1 %501 }
 0x3be   :  { %679 = vrsqrt.f32 %v502_v50  ;;  %vm510_vm7 = vcmp.eq.f32.partialorder %v502_v50, inf  ;;  %v513_v4 = vand.u32 2147483648, %v502_v50  ;;  %vm512_vm8 = vcmp.eq.f32.partialorder %v502_v50, 0.0 }
 0x3c0   :  { %v678_v52 = vpop.eup %677 }
 0x3c1   :  { %v346_v53 = vsel %vm184_vm3, %v678_v52, 0.0 }
 0x3c2   :  { %347 = vadd.xlane.f32.xlu1 %v346_v53 }
 0x3c4   :  { %v680_v54 = vpop.eup %679 }
 0x3c5   :  { %v504_v55 = vmul.f32 %v680_v54, %v502_v50  ;;  %v187_v56 = vpop.xlane.xlu1 %186 }
 0x3c6   :  { %v188_v57 = vsub.f32 %v989_v48, %v187_v56  ;;  %v562_v56 = vrot.slane %v561_v46, 2 }
 0x3c7   :  { %v505_v58 = vmul.f32 %v680_v54, %v504_v55  ;;  %v556_v55 = vrot.slane %v555_v45, 2 }
 0x3c8   :  { %v189_v60 = vmul.f32 1.442695, %v188_v57 }
 0x3c9   :  { %v506_v62 = vmul.f32 0.5, %v505_v58  ;;  %v557_v33 = vadd.f32 %v556_v55, %v555_v45 }
 0x3ca   :  { %681 = vpow2.f32 %v189_v60  ;;  %355 = vadd.xlane.f32.xlu1 %v354_v59 }
 0x3cb   :  { %v507_v63 = vsub.f32 1.5, %v506_v62 }
 0x3cd   :  { %v508_v1 = vmul.f32 %v680_v54, %v507_v63  ;;  %v550_v54 = vrot.slane %v549_v44, 2 }
 0x3cf   :  { %v509_v2 = vmul.f32 %v508_v1, %v502_v50  ;;  %v551_v32 = vadd.f32 %v550_v54, %v549_v44 }
 0x3d0   :  { %v1093_v3 = vpop.eup %681 }
 0x3d1   :  { %v511_v7 = vsel %vm510_vm7, %v502_v50, %v509_v2  ;;  %v191_v48 = vsel %vm184_vm3, %v1093_v3, 0.0 }
 0x3d2   :  { %v514_v9 = vsel %vm512_vm8, %v513_v4, %v511_v7  ;;  %192 = vadd.xlane.f32.xlu2 %v191_v48 }
 0x3d3   :  { %v515_v10 = vmax.f32 %v514_v9, 1e-12  ;;  %v552_v9 = vrot.slane %v551_v32, 1 }
 0x3d5   :  { %683 = vrcp.f32 %v515_v10  ;;  %v527_v15 = vand.u32 2147483648, %v515_v10  ;;  %v525_v22 = vand.u32 2147483647, %v515_v10  ;;  %vm521_vm9 = vweird.f32 %v515_v10 }
 0x3d7   :  { %v528_v24 = vor.u32 1.1754944e-38, %v527_v15  ;;  %vm526_vm12 = vcmp.eq.f32.partialorder %v525_v22, 8.507059e+37  ;;  %v723_v15 = vmov 0   ;;  %v553_v22 = vadd.f32 %v552_v9, %v551_v32 }
 0x3db   :  { %v684_v51 = vpop.eup %683 }
 0x3dc   :  { %v517_v11 = vmul.f32 %v684_v51, %v515_v10  ;;  %vm522_vm1 = vweird.f32 %v684_v51  ;;  %v558_v10 = vrot.slane %v557_v33, 1 }
 0x3dd   :  { %vm523_vm11 = vmor %vm521_vm9, %vm522_vm1 }
 0x3de   :  { %v518_v14 = vsub.f32 1.0, %v517_v11 }
 0x3e0   :  { %v519_v61 = vmul.f32 %v684_v51, %v518_v14 }
 0x3e2   :  { %v520_v23 = vadd.f32 %v684_v51, %v519_v61 }
 0x3e4   :  { %v524_v25 = vsel %vm523_vm11, %v684_v51, %v520_v23  ;;  %v559_v23 = vadd.f32 %v558_v10, %v557_v33 }
 0x3e5   :  { %v529_v18 = vsel %vm526_vm12, %v528_v24, %v524_v25  ;;  %vm618_vm12 = vcmask 1045508  }
 0x3e6   :  { %v1098_v6 = vmul.f32 %v529_v18, %v1065_v8  ;;  %v1101_v12 = vmul.f32 %v529_v18, %v1067_v16  ;;  %v1104_v19 = vmul.f32 %v529_v18, %v1069_v17  ;;  %v1107_v27 = vmul.f32 %v529_v18, %v1076_v26 }
 0x3e8   :  { %vm534_vm13 = vcmp.ne.f32.partialorder %v1098_v6, %v1098_v6  ;;  %vm535_vm14 = vcmp.ne.f32.partialorder %v1101_v12, %v1101_v12  ;;  %vm536_vm15 = vcmp.ne.f32.partialorder %v1104_v19, %v1104_v19  ;;  %vm537_vm0 = vcmp.ne.f32.partialorder %v1107_v27, %v1107_v27 }
 0x3e9   :  { %v538_v8 = vsel %vm534_vm13, 1.0, %v718_v0  ;;  %v539_v16 = vsel %vm535_vm14, 1.0, %v718_v0  ;;  %v540_v26 = vsel %vm536_vm15, 1.0, %v718_v0  ;;  %v541_v30 = vsel %vm537_vm0, 1.0, %v718_v0 }
 0x3ea   :  { %v542_v17 = vadd.f32 %v539_v16, %v538_v8  ;;  %vm630_vm13 = vcmask 24592   ;;  %vm632_vm14 = vcmask 39968  }
 0x3ec   :  { %v543_v28 = vadd.f32 %v542_v17, %v540_v26 }
 0x3ee   :  { %v544_v20 = vadd.f32 %v543_v28, %v541_v30  ;;  %v599_v28 = vld.sshfl [vmem:[#allocation1 + $0x8] sm:$0xff pattern:$0x73625140]  ;;  %v600_v30 = vld.sshfl [vmem:[#allocation1 + $0x10] sm:$0xff pattern:$0x73625140] }
 0x3f0   :  { %545 = vadd.xlane.f32.xlu0 %v544_v20  ;;  %v601_v20 = vld.sshfl [vmem:[#allocation1 + $0x18] sm:$0xff pattern:$0x73625140] }
 0x435   :  { %v348_v31 = vpop.xlane.xlu1 %347 }
 0x436   :  { %685 = vlog2.f32 %v348_v31 }
 0x437   :  { %687 = vrcp.f32 %v722_v37 }
 0x43c   :  { %v686_v21 = vpop.eup %685 }
 0x43d   :  { %v350_v34 = vmul.f32 0.6931472, %v686_v21  ;;  %v688_v42 = vpop.eup %687  ;;  %v356_v63 = vpop.xlane.xlu1 %355 }
 0x43e   :  { %v573_v50 = vmul.f32 8.0, %v688_v42  ;;  %vm589_vm8 = vcmp.ge.f32.partialorder %v356_v63, 0.0  ;;  %vm577_vm1 = vweird.f32 %v688_v42 }
 0x43f   :  { %v351_v36 = vsub.f32 %v1086_v47, %v350_v34  ;;  %v567_v47 = vadd.f32 %v566_v41, %v979_v35  ;;  %v563_v35 = vadd.f32 %v562_v56, %v561_v46  ;;  %v590_v61 = vsel %vm589_vm8, 1, %v723_v15  ;;  %v598_v34 = vld.sshfl [vmem:[#allocation1] sm:$0xff pattern:$0x73625140] }
 0x440   :  { %v574_v60 = vsub.f32 1.0, %v573_v50  ;;  %v591_v18 = vperm.slane %v590_v61, 0 }
 0x441   :  { %627 = vrot.lane.b32.xlu2 %v351_v36, %s719_s13  ;;  %v568_v59 = vrot.slane %v567_v47, 2  ;;  %v564_v51 = vrot.slane %v563_v35, 1 }
 0x442   :  { %v575_v4 = vmul.f32 %v688_v42, %v574_v60  ;;  %vm592_vm9 = vcmp.eq.s32.totalorder %v591_v18, 1 }
 0x443   :  { %v569_v1 = vadd.f32 %v568_v59, %v567_v47  ;;  %v565_v24 = vadd.f32 %v564_v51, %v563_v35  ;;  %vm1141_vm11 = vmand %vm1018_vm5, %vm592_vm9  ;;  %vm620_vm5 = vcmask 1043456  }
 0x444   :  { %v576_v14 = vadd.f32 %v688_v42, %v575_v4 }
 0x445   :  { %v193_v0 = vpop.xlane.xlu2 %192  ;;  %v570_v11 = vrot.slane %v569_v1, 1 }
 0x446   :  { %689 = vrcp.f32 %v193_v0  ;;  %v205_v53 = vand.u32 2147483648, %v193_v0  ;;  %v203_v58 = vand.u32 2147483647, %v193_v0  ;;  %vm199_vm4 = vweird.f32 %v193_v0 }
 0x447   :  { %v571_v25 = vadd.f32 %v570_v11, %v569_v1 }
 0x448   :  { %v206_v29 = vor.u32 1.1754944e-38, %v205_v53  ;;  %vm204_vm7 = vcmp.eq.f32.partialorder %v203_v58, 8.507059e+37 }
 0x44c   :  { %v690_v43 = vpop.eup %689 }
 0x44d   :  { %v195_v49 = vmul.f32 %v690_v43, %v193_v0  ;;  %vm200_vm2 = vweird.f32 %v690_v43 }
 0x44e   :  { %vm201_vm6 = vmor %vm199_vm4, %vm200_vm2 }
 0x44f   :  { %v196_v52 = vsub.f32 1.0, %v195_v49 }
 0x451   :  { %v197_v57 = vmul.f32 %v690_v43, %v196_v52 }
 0x453   :  { %v198_v62 = vadd.f32 %v690_v43, %v197_v57 }
 0x455   :  { %v202_v2 = vsel %vm201_vm6, %v690_v43, %v198_v62 }
 0x456   :  { %v207_v7 = vsel %vm204_vm7, %v206_v29, %v202_v2 }
 0x457   :  { %v208_v48 = vmul.f32 %v1093_v3, %v207_v7  ;;  %v578_v3 = vsel %vm577_vm1, %v688_v42, %v576_v14 }
 0x458   :  { %v579_v8 = vmul.f32 %v578_v3, %v553_v22  ;;  %v580_v16 = vmul.f32 %v578_v3, %v559_v23  ;;  %v581_v17 = vmul.f32 %v578_v3, %v565_v24  ;;  %v582_v26 = vmul.f32 %v578_v3, %v571_v25 }
 0x459   :  { %625 = vst.msk [vmem:[%s1174_s6] sm:$0xff] %vm184_vm3, %v208_v48 }
 0x463   :  { %v546_v31 = vpop.xlane.xlu0 %545 }
 0x464   :  { %vm547_vm3 = vcmp.gt.f32.partialorder %v546_v31, 0.0 }
 0x465   :  { %v585_v36 = vsel %vm547_vm3, %v579_v8, %v1098_v6  ;;  %v586_v0 = vsel %vm547_vm3, %v580_v16, %v1101_v12  ;;  %v587_v37 = vsel %vm547_vm3, %v581_v17, %v1104_v19  ;;  %v588_v38 = vsel %vm547_vm3, %v582_v26, %v1107_v27 }
 0x466   :  { %v607_v39 = vsel %vm1141_vm11, %v586_v0, %v599_v28  ;;  %v608_v13 = vsel %vm1141_vm11, %v587_v37, %v600_v30  ;;  %v609_v40 = vsel %vm1141_vm11, %v588_v38, %v601_v20  ;;  %v606_v12 = vsel %vm1141_vm11, %v585_v36, %v598_v34 }
 0x467   :  { %v614_v41 = vrot.slane %v607_v39, 6  ;;  %v615_v42 = vrot.slane %v608_v13, 4  ;;  %v616_v6 = vrot.slane %v609_v40, 2 }
 0x469   :  { %v617_v19 = vsel %vm324_vm10, %v606_v12, %v614_v41  ;;  %v619_v27 = vsel %vm618_vm12, %v615_v42, %v616_v6 }
 0x46a   :  { %v621_v43 = vsel %vm620_vm5, %v617_v19, %v619_v27 }
 0x46b   :  { %623 = vst [vmem:[%s1176_s8] sm:$0xff] %v621_v43 }
 0x49b   :  { %v628_v44 = vpop.permute.xlu2 %627 }
 0x49c   :  { %631 = vst.msk [vmem:[%s1174_s6] sm:$0x1] %vm630_vm13, %v628_v44 }
 0x49d   :  { %633 = vst.msk [vmem:[%s1174_s6] sm:$0xff] %vm632_vm14, %v1051_v5 }
 0x49e   :  { %715 = dma.done.wait [#allocation4], 64  }
 0x49f   :  { %716 = vsyncadd [#allocation4], 4294967232 }
 0x4a0   :  { %657 = vsyncpa [#allocation4], 1 }

</bundles_post_ra>
